<compile_context>
chip_gen: v5e
topology: v5e:2x2
jax: 0.10.0
libtpu: 0.0.40
codegen_flags: <defaults>
</compile_context>

<pallas_src>
import functools

import jax
import jax.numpy as jnp
from jax.experimental import pallas as pl
from jax.experimental.pallas import tpu as pltpu


# F.normalize(p=2, dim=1): y / max(||y||, 1e-12) == y * rsqrt(max(||y||^2, 1e-24)).
# Plain Python float -> inline literal (a jnp scalar here would be a captured
# constant, which pallas_call rejects).
_EPS_SQ = 1e-24


def _normalize_rows(y):
    ss = jnp.sum(y * y, axis=1, keepdims=True)
    return y * jax.lax.rsqrt(jnp.maximum(ss, _EPS_SQ))


def _kernel_train(x_ref, w_ref, b_ref, noise_ref, o1_ref, o2_ref, o3_ref, *, d_out):
    # Single fused MXU pass for both linear layers: w_ref = [W1_t | W2_t].
    y = jnp.dot(x_ref[...], w_ref[...], preferred_element_type=jnp.float32) + b_ref[...]
    o1_ref[...] = _normalize_rows(y[:, :d_out])
    o2 = _normalize_rows(y[:, d_out:])
    o2_ref[...] = o2
    o3_ref[...] = o2 + noise_ref[...]


def _kernel_eval(x_ref, w_ref, b_ref, o1_ref, o2_ref, *, d_out):
    y = jnp.dot(x_ref[...], w_ref[...], preferred_element_type=jnp.float32) + b_ref[...]
    o1_ref[...] = _normalize_rows(y[:, :d_out])
    o2_ref[...] = _normalize_rows(y[:, d_out:])


def prepare_params(w1, b1, w2, b2):
    """One-time (outside jit) fusion of the two nn.Linear params into a single
    MXU operand. w1/w2: (d_out, d_in) as in nn.Linear; returns
    w_cat: (d_in, 2*d_out), b_cat: (1, 2*d_out)."""
    w_cat = jnp.concatenate([w1.T, w2.T], axis=1).astype(jnp.float32)
    b_cat = jnp.concatenate([b1, b2]).reshape(1, -1).astype(jnp.float32)
    return w_cat, b_cat


def _pick_block_rows(n_rows):
    # >=2 grid steps whenever possible so the row axis can be sharded across
    # the two v7x TensorCores; blocks are multiples of 8 and divide n_rows.
    if n_rows % 16 != 0:
        return n_rows  # single step; full-extent block satisfies the (8,128) rule
    target = min(max(n_rows // 2, 8), 256)
    br = (target // 8) * 8
    while n_rows % br != 0:
        br -= 8
    return br


@functools.partial(jax.jit, static_argnames=("is_train", "block_rows"))
def my_model_forward(x, w_cat, b_cat, noise=None, is_train=True, block_rows=None):
    """x: (N, d_in); w_cat: (d_in, 2*d_out); b_cat: (1, 2*d_out) (see prepare_params)."""
    x = x.astype(jnp.float32)
    n_rows, d_in = x.shape
    d_out = w_cat.shape[1] // 2

    if block_rows is None:
        block_rows = _pick_block_rows(n_rows)
    assert n_rows % block_rows == 0, (n_rows, block_rows)
    grid = (n_rows // block_rows,)

    x_spec = pl.BlockSpec((block_rows, d_in), lambda i: (i, 0))
    w_spec = pl.BlockSpec((d_in, 2 * d_out), lambda i: (0, 0))
    b_spec = pl.BlockSpec((1, 2 * d_out), lambda i: (0, 0))
    o_spec = pl.BlockSpec((block_rows, d_out), lambda i: (i, 0))
    o_shape = jax.ShapeDtypeStruct((n_rows, d_out), jnp.float32)
    # At these tiny tiles VMEM is nowhere near the limit; re-check vmem_limit_bytes
    # if d_in/d_out/block_rows are ever scaled up (16 MiB default scoped on v5e).
    cparams = pltpu.CompilerParams(dimension_semantics=("parallel",))

    if is_train:
        if noise is None or tuple(noise.shape) != (n_rows, d_out):
            raise ValueError(
                f"is_train=True requires noise of shape {(n_rows, d_out)}, got "
                f"{None if noise is None else noise.shape}")
        out1, out2, out3 = pl.pallas_call(
            functools.partial(_kernel_train, d_out=d_out),
            grid=grid,
            in_specs=[x_spec, w_spec, b_spec, o_spec],
            out_specs=(o_spec, o_spec, o_spec),
            out_shape=(o_shape, o_shape, o_shape),
            compiler_params=cparams,
        )(x, w_cat, b_cat, noise.astype(jnp.float32))
        return out1, out2, out3
    else:
        out1, out2 = pl.pallas_call(
            functools.partial(_kernel_eval, d_out=d_out),
            grid=grid,
            in_specs=[x_spec, w_spec, b_spec],
            out_specs=(o_spec, o_spec),
            out_shape=(o_shape, o_shape),
            compiler_params=cparams,
        )(x, w_cat, b_cat)
        return out1, out2, out2  # out3 aliases out2 in eval mode (no copy)


def init_params(key, d_in, d_out):
    # Deterministic synthetic init (shapes match nn.Linear(d_in, d_out)).
    k1, k2, k3, k4 = jax.random.split(key, 4)
    bound = 1.0 / jnp.sqrt(d_in)
    w1 = jax.random.uniform(k1, (d_out, d_in), jnp.float32, -bound, bound)
    b1 = jax.random.uniform(k2, (d_out,), jnp.float32, -bound, bound)
    w2 = jax.random.uniform(k3, (d_out, d_in), jnp.float32, -bound, bound)
    b2 = jax.random.uniform(k4, (d_out,), jnp.float32, -bound, bound)
    # alpha / beta exist in the PyTorch module but are unused in forward().
    beta = jnp.float32(0.99999)
    alpha = jnp.float32(0.5)
    return w1, b1, w2, b2, beta, alpha


if __name__ == "__main__":
    key = jax.random.PRNGKey(0)
    k_x, k_p, k_n = jax.random.split(key, 3)

    N, D_IN, D_OUT = 16, 32, 16       # dims = [32, 16], batch of 16 nodes
    SIGMA = 0.5                       # stand-in for args.sigma

    x = jax.random.normal(k_x, (N, D_IN), jnp.float32)
    w1, b1, w2, b2, beta, alpha = init_params(k_p, D_IN, D_OUT)
    # One-time param fusion, hoisted out of the jitted per-call path.
    w_cat, b_cat = prepare_params(w1, b1, w2, b2)

    # TODO(synk): noise is still a precomputed HBM input; generating it in-kernel
    # (pltpu.prng_seed + pltpu.stateful_normal with an SMEM seed) would drop one
    # input stream and the host-side RNG launch, kept external here so out3 can
    # be verified deterministically against the reference.
    noise = SIGMA * jax.random.normal(k_n, (N, D_OUT), jnp.float32)

    # Training-mode forward (noise path active).
    out1, out2, out3 = my_model_forward(x, w_cat, b_cat, noise, is_train=True)
    jax.block_until_ready((out1, out2, out3))

    # Eval-mode forward (no noise input, no out3 output stream).
    e1, e2, e3 = my_model_forward(x, w_cat, b_cat, is_train=False)
    jax.block_until_ready((e1, e2, e3))

    # Sanity check against plain-JAX reference.
    def ref(x, w, b):
        y = x @ w.T + b
        return y / jnp.maximum(
            jnp.sqrt(jnp.sum(y * y, axis=1, keepdims=True)), 1e-12)

    r1 = ref(x, w1, b1)
    r2 = ref(x, w2, b2)
    # rsqrt-based normalize may drift a few ulps vs divide-based reference.
    assert jnp.allclose(out1, r1, atol=1e-4)
    assert jnp.allclose(out2, r2, atol=1e-4)
    assert jnp.allclose(out3, r2 + noise, atol=1e-4)
    assert jnp.allclose(e1, r1, atol=1e-4)
    assert jnp.allclose(e2, r2, atol=1e-4)
    assert jnp.allclose(e3, e2)

    print("KERNEL_OK")
</pallas_src>

<mosaic_0001>
module attributes {stable_mosaic.version = 11 : i64} {
  func.func @_kernel_train(%arg0: i32, %arg1: memref<8x32xf32, #tpu.memory_space<vmem>>, %arg2: memref<32x32xf32, #tpu.memory_space<vmem>>, %arg3: memref<1x32xf32, #tpu.memory_space<vmem>>, %arg4: memref<8x16xf32, #tpu.memory_space<vmem>>, %arg5: memref<8x16xf32, #tpu.memory_space<vmem>>, %arg6: memref<8x16xf32, #tpu.memory_space<vmem>>, %arg7: memref<8x16xf32, #tpu.memory_space<vmem>>) attributes {dimension_semantics = [#tpu.dimension_semantics<parallel>], iteration_bounds = array<i64: 2>, scalar_prefetch = 0 : i64, scratch_operands = 0 : i64, tpu.core_type = #tpu.core_type<tc>, window_params = [{transform_indices = @transform_0, window_bounds = array<i64: 8, 32>}, {pipeline_mode = #tpu.pipeline_mode<synchronous>, transform_indices = @transform_1, window_bounds = array<i64: 32, 32>}, {pipeline_mode = #tpu.pipeline_mode<synchronous>, transform_indices = @transform_2, window_bounds = array<i64: 1, 32>}, {transform_indices = @transform_3, window_bounds = array<i64: 8, 16>}, {transform_indices = @transform_4, window_bounds = array<i64: 8, 16>}, {transform_indices = @transform_5, window_bounds = array<i64: 8, 16>}, {transform_indices = @transform_6, window_bounds = array<i64: 8, 16>}]} {
    %c0 = arith.constant 0 : index
    %c0_0 = arith.constant 0 : index
    %0 = vector.load %arg1[%c0, %c0_0] : memref<8x32xf32, #tpu.memory_space<vmem>>, vector<8x32xf32>
    %c0_1 = arith.constant 0 : index
    %c0_2 = arith.constant 0 : index
    %1 = vector.load %arg2[%c0_1, %c0_2] : memref<32x32xf32, #tpu.memory_space<vmem>>, vector<32x32xf32>
    %cst = arith.constant dense<0.000000e+00> : vector<8x32xf32>
    %2 = tpu.matmul %0, %1, %cst {dimension_numbers = #tpu.dot_dimension_numbers<[1], [0], [0], [1], [0, 0, 1, 1], [], []>} : vector<8x32xf32>, vector<32x32xf32>, vector<8x32xf32> -> vector<8x32xf32>
    %c0_3 = arith.constant 0 : index
    %c0_4 = arith.constant 0 : index
    %3 = vector.load %arg3[%c0_3, %c0_4] : memref<1x32xf32, #tpu.memory_space<vmem>>, vector<1x32xf32>
    %4 = vector.broadcast %3 : vector<1x32xf32> to vector<8x32xf32>
    %5 = arith.addf %2, %4 : vector<8x32xf32>
    %6 = vector.extract_strided_slice %5 {offsets = [0, 0], sizes = [8, 16], strides = [1, 1]} : vector<8x32xf32> to vector<8x16xf32>
    %7 = arith.mulf %6, %6 : vector<8x16xf32>
    %cst_5 = arith.constant dense<0.000000e+00> : vector<8xf32>
    %8 = vector.multi_reduction <add>, %7, %cst_5 [1] : vector<8x16xf32> to vector<8xf32>
    %9 = vector.shape_cast %8 : vector<8xf32> to vector<8x1xf32>
    %cst_6 = arith.constant 1.000000e-24 : f32
    %10 = vector.broadcast %cst_6 : f32 to vector<8x1xf32>
    %11 = arith.maximumf %9, %10 : vector<8x1xf32>
    %12 = math.rsqrt %11 : vector<8x1xf32>
    %13 = vector.broadcast %12 : vector<8x1xf32> to vector<8x16xf32>
    %14 = arith.mulf %6, %13 : vector<8x16xf32>
    %c0_7 = arith.constant 0 : index
    %c0_8 = arith.constant 0 : index
    %15 = vector.load %arg5[%c0_7, %c0_8] : memref<8x16xf32, #tpu.memory_space<vmem>>, vector<8x16xf32>
    tpu.vector_store %arg5[%c0_7, %c0_8], %14 {strides = array<i32>} : memref<8x16xf32, #tpu.memory_space<vmem>>, vector<8x16xf32>,
    %16 = vector.extract_strided_slice %5 {offsets = [0, 16], sizes = [8, 16], strides = [1, 1]} : vector<8x32xf32> to vector<8x16xf32>
    %17 = arith.mulf %16, %16 : vector<8x16xf32>
    %cst_9 = arith.constant dense<0.000000e+00> : vector<8xf32>
    %18 = vector.multi_reduction <add>, %17, %cst_9 [1] : vector<8x16xf32> to vector<8xf32>
    %19 = vector.shape_cast %18 : vector<8xf32> to vector<8x1xf32>
    %cst_10 = arith.constant 1.000000e-24 : f32
    %20 = vector.broadcast %cst_10 : f32 to vector<8x1xf32>
    %21 = arith.maximumf %19, %20 : vector<8x1xf32>
    %22 = math.rsqrt %21 : vector<8x1xf32>
    %23 = vector.broadcast %22 : vector<8x1xf32> to vector<8x16xf32>
    %24 = arith.mulf %16, %23 : vector<8x16xf32>
    %c0_11 = arith.constant 0 : index
    %c0_12 = arith.constant 0 : index
    %25 = vector.load %arg6[%c0_11, %c0_12] : memref<8x16xf32, #tpu.memory_space<vmem>>, vector<8x16xf32>
    tpu.vector_store %arg6[%c0_11, %c0_12], %24 {strides = array<i32>} : memref<8x16xf32, #tpu.memory_space<vmem>>, vector<8x16xf32>,
    %c0_13 = arith.constant 0 : index
    %c0_14 = arith.constant 0 : index
    %26 = vector.load %arg4[%c0_13, %c0_14] : memref<8x16xf32, #tpu.memory_space<vmem>>, vector<8x16xf32>
    %27 = arith.addf %24, %26 : vector<8x16xf32>
    %c0_15 = arith.constant 0 : index
    %c0_16 = arith.constant 0 : index
    %28 = vector.load %arg7[%c0_15, %c0_16] : memref<8x16xf32, #tpu.memory_space<vmem>>, vector<8x16xf32>
    tpu.vector_store %arg7[%c0_15, %c0_16], %27 {strides = array<i32>} : memref<8x16xf32, #tpu.memory_space<vmem>>, vector<8x16xf32>,
    return
  }
  func.func @transform_0(%arg0: i32) -> (i32, i32) {
    %c0_i32 = arith.constant 0 : i32
    %c0_i32_0 = arith.constant 0 : i32
    return %arg0, %c0_i32 : i32, i32
  }
  func.func @transform_1(%arg0: i32) -> (i32, i32) {
    %c0_i32 = arith.constant 0 : i32
    %c0_i32_0 = arith.constant 0 : i32
    %c0_i32_1 = arith.constant 0 : i32
    return %c0_i32, %c0_i32_0 : i32, i32
  }
  func.func @transform_2(%arg0: i32) -> (i32, i32) {
    %c0_i32 = arith.constant 0 : i32
    %c0_i32_0 = arith.constant 0 : i32
    %c0_i32_1 = arith.constant 0 : i32
    return %c0_i32, %c0_i32_0 : i32, i32
  }
  func.func @transform_3(%arg0: i32) -> (i32, i32) {
    %c0_i32 = arith.constant 0 : i32
    %c0_i32_0 = arith.constant 0 : i32
    return %arg0, %c0_i32 : i32, i32
  }
  func.func @transform_4(%arg0: i32) -> (i32, i32) {
    %c0_i32 = arith.constant 0 : i32
    %c0_i32_0 = arith.constant 0 : i32
    return %arg0, %c0_i32 : i32, i32
  }
  func.func @transform_5(%arg0: i32) -> (i32, i32) {
    %c0_i32 = arith.constant 0 : i32
    %c0_i32_0 = arith.constant 0 : i32
    return %arg0, %c0_i32 : i32, i32
  }
  func.func @transform_6(%arg0: i32) -> (i32, i32) {
    %c0_i32 = arith.constant 0 : i32
    %c0_i32_0 = arith.constant 0 : i32
    return %arg0, %c0_i32 : i32, i32
  }
}

</mosaic_0001>

<bundles_post_ra>
// kernel: my_model_forward.1
= control target key start
LH: loop header
LB: loop body
LE: loop exit
PB: predicated region body
PF: predicated region fallthrough
CT: control target
= control target key end

     0   :  { %s1255_s0 = inlined_call_operand.hbm [shape: f32[16,32], index: 0, kind: input, shape index: {}]   ;;  %s1256_s1 = inlined_call_operand.hbm [shape: f32[32,32], index: 1, kind: input, shape index: {}]   ;;  %s1257_s2 = inlined_call_operand.vmem [shape: f32[1,32], index: 2, kind: input, shape index: {}]   ;;  %s1258_s3 = inlined_call_operand.hbm [shape: f32[16,16], index: 3, kind: input, shape index: {}]   ;;  %s1259_s4 = inlined_call_operand.hbm [shape: f32[16,16], index: 4, kind: output, shape index: {0}]   ;;  %s1260_s5 = inlined_call_operand.hbm [shape: f32[16,16], index: 5, kind: output, shape index: {1}]   ;;  %s1261_s6 = inlined_call_operand.hbm [shape: f32[16,16], index: 6, kind: output, shape index: {2}]  }
   0x1   :  { %1265 = sst [smem:[#allocation19_spill]] %s1255_s0 }
   0x2   :  { %1266 = sst [smem:[#allocation20_spill]] %s1256_s1 }
   0x3   :  { %12 = vsyncpa [#allocation3], 0 }
   0x4   :  { %14 = vsyncpa [#allocation3 + $0x1], 0 }
   0x5   :  { %15 = vsyncpa [#allocation6], 0 }
   0x6   :  { %16 = vsyncpa [#allocation4], 0 }
   0x7   :  { %18 = vsyncpa [#allocation4 + $0x1], 0 }
   0x8   :  { %19 = vsyncpa [#allocation10], 0 }
   0x9   :  { %21 = vsyncpa [#allocation10 + $0x1], 0  ;;  %s1014_s21 = smov 0   ;;  %s1016_s22 = smov 0  }
   0xa   :  { %s1018_s23 = smov 0   ;;  %s1020_s24 = smov 0  }
   0xb LB: > { %1267 = sst [smem:[#allocation17_spill]] %s968_s23  ;;  %s1035_s25 = sadd.s32 4294967295, %s972_s24   ;;  %s972_s24 = sphi %s1020_s24, %s1285_s24   ;;  %s968_s23 = sphi %s1018_s23, %s1282_s23   ;;  %s964_s22 = sphi %s1016_s22, %s1284_s22   ;;  %s960_s21 = sphi %s1014_s21, %s1283_s21  }
   0xc   : > { %s1262_s26 = sadd.s32 4294967294, %s972_s24   ;;  %s1039_s27 = sadd.s32 1, %s972_s24  }
   0xd   : > { %s34_s28 = sadd.s32 1, %s968_s23  ;;  %s31_s29 = ssub.s32 %s972_s24, %s1039_s27 }
   0xe   : > { %p41_p0 = scmp.ne.s32.totalorder %s968_s23, %s964_s22  ;;  %p32_p1 = scmp.eq.s32.totalorder %s31_s29, 0 }
   0xf   : > { %p42_p2 = scmp.eq.s32.totalorder %s972_s24, 0  ;;  %p47_p3 = scmp.ne.s32.totalorder %s964_s22, %s960_s21 }
  0x10   : > { %p139_p4 = scmp.eq.s32.totalorder %s1035_s25, 1  ;;  %p145_p6 = scmp.eq.s32.totalorder %s1262_s26, 1 }
  0x11   : > { %s1051_s30 = scalar_select %p32_p1, %s968_s23, %s34_s28  }
  0x12   : > { %p1053_p5 = por %p139_p4, %p41_p0  ;;  %p1059_p7 = por %p42_p2, %p41_p0 }
  0x13   : > { %1268 = sst [smem:[#allocation18_spill]] %s1051_s30  ;;  %p1067_p9 = por %p145_p6, %p47_p3 }
  0x14   : > { %p703_p10 = scmp.lt.s32.totalorder %s972_s24, 2  ;;  %s234_s10 = sand.u32 1, %s972_s24  }
  0x15   : > { %s236_s11 = sand.u32 1, %s968_s23   ;;  %s648_s13 = sshll.u32 %s972_s24, 3 }
  0x16   : > { %s1074_s12 = sshll.u32 %s236_s11, 3  ;;  %s1272_s0 = sld [smem:[#allocation19_spill]] }
  0x17   : > { %s238_s18 = scalar_lea.vmem [#allocation2], %s1074_s12  ;;  %p1083_p11 = pnand %p703_p10, %p1059_p7 }
  0x18   : > { %s246_s19 = sshll.u32 %s238_s18, 4  ;;  %p1264_p12 = scmp.eq.s32.totalorder %s1035_s25, 0  ;;  %s247_s19 = int_to_ptr.vmem [resolvable:$true] %s246_s19 }
  0x19   : > { %p644_p13 = scmp.ge.s32.totalorder %s972_s24, 1  ;;  %s1089_s28 = scalar_lea.sflag [#allocation3], %s234_s10 }
  0x1a   : > { %p752_p1 = pneg %p1083_p11 }
  0x1c   : > { %s242_s16 = scalar_lea.hbm %s1272_s0, %s648_s13  ;;  %s755_s15 = scalar_lea.hbm %s1272_s0, 16 }
  0x1d   : > { %s244_s17 = sshll.u32 %s242_s16, 4  ;;  %s245_s17 = int_to_ptr.hbm [resolvable:$true] %s244_s17 }
  0x1e   : > { %s748_s29 = sshra.s32 %s245_s17, 4  ;;  %s749_s29 = int_to_ptr.hbm [resolvable:$true] %s748_s29 }
  0x1f   : > { %s750_s11 = scalar_lea.hbm %s749_s29, 8  ;;  %p756_p6 = scmp.lt.s32.totalorder %s749_s29, %s1272_s0 }
  0x20   : > { %p751_p0 = scmp.ne.s32.totalorder %s749_s29, %s750_s11  ;;  %p757_p7 = scmp.lt.s32.totalorder %s755_s15, %s750_s11 }
  0x22   : > { %p753_p2 = pnand %p752_p1, %p751_p0  ;;  %p758_p10 = por %p757_p7, %p756_p6 }
  0x24   : > { %p754_p4 = pneg %p753_p2 }
  0x26   : > { %p759_p8 = pnand %p758_p10, %p754_p4 }
  0x28   : > { %762 = shalt.err (!%p759_p8)
}
  0x29   : > { %688 = dma.hbm_to_vmem [thread:$0]  (!%p1083_p11), %s245_s17, 128, %s247_s19, %s1089_s28  }
  0x2a   : > { %p1110_p0 = por %p1264_p12, %p47_p3  ;;  %p204_p2 = scmp.lt.s32.totalorder %s972_s24, 3 }
  0x2b   : > { %s1275_s1 = sld [smem:[#allocation20_spill]]  ;;  %s261_s16 = scalar_lea.hbm %s1258_s3, %s648_s13 }
  0x2c   : > { %p1123_p8 = pnand %p644_p13, %p204_p2  ;;  %s974_s17 = smov [#allocation5]  }
  0x2d   : > { %s217_s19 = sshll.u32 %s974_s17, 4  ;;  %s263_s26 = sshll.u32 %s261_s16, 4  ;;  %s218_s19 = int_to_ptr.vmem [resolvable:$true] %s217_s19  ;;  %s264_s26 = int_to_ptr.hbm [resolvable:$true] %s263_s26 }
  0x2e   : > { %p681_p3 = pneg %p1123_p8  ;;  %s257_s29 = scalar_lea.vmem [#allocation7], %s1074_s12 }
  0x2f   : > { %s265_s11 = sshll.u32 %s257_s29, 4  ;;  %s975_s13 = smov 128   ;;  %s266_s11 = int_to_ptr.vmem [resolvable:$true] %s265_s11 }
  0x30   : > { %p682_p4 = pnand %p681_p3, %p1264_p12  ;;  %s976_s14 = smov 8  }
  0x31   : > { %s215_s8 = sshll.u32 %s1275_s1, 4  ;;  %s808_s15 = sshra.s32 %s264_s26, 4  ;;  %s216_s8 = int_to_ptr.hbm [resolvable:$true] %s215_s8  ;;  %s809_s15 = int_to_ptr.hbm [resolvable:$true] %s808_s15 }
  0x32   : > { %684 = dma.hbm_to_vmem [thread:$0]  (!%p682_p4), %s216_s8, 512, %s218_s19, [#allocation6], %s975_s13, %s975_s13, %s976_s14  }
  0x33   : > { %s810_s0 = scalar_lea.hbm %s809_s15, 8  ;;  %s815_s16 = scalar_lea.hbm %s1258_s3, 16 }
  0x34   : > { %p811_p13 = scmp.ne.s32.totalorder %s809_s15, %s810_s0  ;;  %p816_p10 = scmp.lt.s32.totalorder %s809_s15, %s1258_s3 }
  0x35   : > { %p817_p2 = scmp.lt.s32.totalorder %s815_s16, %s810_s0 }
  0x36   : > { %p813_p6 = pnand %p811_p13, %p752_p1 }
  0x37   : > { %p818_p3 = por %p817_p2, %p816_p10 }
  0x38   : > { %p814_p7 = pneg %p813_p6 }
  0x3a   : > { %p819_p12 = pnand %p818_p3, %p814_p7 }
  0x3c   : > { %822 = shalt.err (!%p819_p12)
}
  0x3d   : > { %691 = dma.hbm_to_vmem [thread:$0]  (!%p1083_p11), %s264_s26, 128, %s266_s11, %s1089_s28  }
  0x3e   : > { %274 = sbr.rel (%p1123_p8) target bundleno = 573 (0x23d), region = 36  ;;  %s276_s1 = sand.u32 (!%p1123_p8), 1, %s1035_s25  }
  0x3f   : > { %s278_s12 = sand.u32 (!%p1123_p8), 1, %s964_s22   ;;  %s277_s0 = scalar_lea.sflag (!%p1123_p8), [#allocation3], %s276_s1 }
  0x40   : > { %s1150_s23 = sshll.u32 (!%p1123_p8), %s278_s12, 3 }
  0x41   : > { %s280_s30 = scalar_lea.vmem (!%p1123_p8), [#allocation2], %s1150_s23 }
  0x43   : > { %939 = dma.done.wait (%p1110_p0), %s277_s0, 128  }
  0x44   : > { %941 = vsyncadd (%p1110_p0), %s277_s0, 4294967168  ;;  %p1277_p11 = scmp.eq.s32.totalorder %s1035_s25, 0 }
  0x46   : > { %943 = dma.done.wait (%p1277_p11), [#allocation6], 512   ;;  %p1278_p12 = pmov %p1277_p11 }
  0x47   : > { %s295_s26 = scalar_lea.vmem [#allocation7], %s1150_s23 }
  0x48   : > { %945 = vsyncadd (%p1278_p12), [#allocation6], 4294966784 }
  0x49   : > { %947 = dma.done.wait (%p1110_p0), %s277_s0, 128  }
  0x4a   : > { %949 = vsyncadd (%p1110_p0), %s277_s0, 4294967168  ;;  %v344_v0 = vld [vmem:[#allocation5 + $0x18] sm:$0xff]  ;;  %v343_v1 = vld [vmem:[#allocation5 + $0x10] sm:$0xff]  ;;  %s977_s20 = smov 16   ;;  %vm349_vm0 = vcmask 261120   ;;  %vm374_vm1 = vcmask 130048  }
  0x4b   : > { %365 = vmatpush.msra.mxu0 %v344_v0  ;;  %v415_v2 = vld [vmem:[%s295_s26] sm:$0xff]  ;;  %v340_v5 = vld [vmem:[%s280_s30] sm:$0xff]  ;;  %s978_s10 = smov 112   ;;  %s325_s18 = scalar_lea.vmem [#allocation8], %s1150_s23 }
  0x4c   : > { %v342_v3 = vld [vmem:[#allocation5 + $0x8] sm:$0xff]  ;;  %417 = vrot.lane.b32.xlu1 %v415_v2, %s977_s20  ;;  %v341_v4 = vld [vmem:[#allocation5] sm:$0xff]  ;;  %v743_v6 = vld [vmem:[%s1257_s2] ss:$0 sm:$0xff]  ;;  %s1177_s19 = sshll.u32 %s1035_s25, 3  ;;  %s449_s14 = sshll.u32 %s325_s18, 4  ;;  %s450_s14 = int_to_ptr.vmem [resolvable:$true] %s449_s14 }
  0x4d   : > { %366 = vmatpush.msra.mxu0 %v343_v1  ;;  %s447_s13 = scalar_lea.hbm %s1259_s4, %s1177_s19  ;;  %s427_s17 = scalar_lea.sflag [#allocation4], %s278_s12 }
  0x4e   : > { %s451_s15 = sshll.u32 %s447_s13, 4  ;;  %s858_s20 = scalar_lea.hbm %s1259_s4, 16  ;;  %s452_s15 = int_to_ptr.hbm [resolvable:$true] %s451_s15 }
  0x4f   : > { %367 = vmatpush.msra.mxu0 %v342_v3  ;;  %s852_s16 = sshra.s32 %s452_s15, 4  ;;  %s853_s16 = int_to_ptr.hbm [resolvable:$true] %s852_s16 }
  0x50   : > { %s854_s0 = scalar_lea.hbm %s853_s16, 8  ;;  %p859_p4 = scmp.lt.s32.totalorder %s853_s16, %s1259_s4 }
  0x51   : > { %368 = vmatpush.msra.mxu0 %v341_v4  ;;  %p855_p1 = scmp.ne.s32.totalorder %s853_s16, %s854_s0  ;;  %p860_p13 = scmp.lt.s32.totalorder %s858_s20, %s854_s0 }
  0x52   : > { %658 = vmatmul.msk.f32.vlgmr.msra.gmra.mxu0 %vm349_vm0, %v340_v5 }
  0x53   : > { %p856_p0 = pnand %p855_p1, %p1053_p5  ;;  %p861_p6 = por %p860_p13, %p859_p4 }
  0x55   : > { %p857_p8 = pneg %p856_p0 }
  0x57   : > { %p862_p7 = pnand %p861_p6, %p857_p8 }
  0xbe   : > { %v418_v11 = vpop.permute.xlu1 %417 }
  0xcf   : > { %v370_v7 = vpop.f32.mrf.mxu0 }
  0xd0   : > { %v371_v8 = vadd.f32 %v743_v6, %v370_v7 }
  0xd2   : > { %v373_v9 = vmul.f32 %v371_v8, %v371_v8 }
  0xd4   : > { %392 = vrot.lane.b32.xlu0 %v373_v9, %s978_s10  ;;  %v375_v10 = vsel %vm374_vm1, %v373_v9, 0.0 }
  0xd5   : > { %376 = vadd.xlane.f32.xlu1 %v375_v10 }
 0x146   : > { %v393_v12 = vpop.permute.xlu0 %392 }
 0x147   : > { %v395_v13 = vsel %vm374_vm1, %v393_v12, 0.0 }
 0x148   : > { %396 = vadd.xlane.f32.xlu0 %v395_v13  ;;  %v377_v14 = vpop.xlane.xlu1 %376 }
 0x149   : > { %v378_v15 = vmax.f32 %v377_v14, 1e-24 }
 0x14b   : > { %744 = vrsqrt.f32 %v378_v15  ;;  %vm385_vm3 = vweird.f32 %v378_v15 }
 0x151   : > { %v745_v16 = vpop.eup %744 }
 0x152   : > { %v380_v17 = vmul.f32 %v745_v16, %v378_v15  ;;  %vm386_vm2 = vweird.f32 %v745_v16 }
 0x153   : > { %vm387_vm4 = vmor %vm385_vm3, %vm386_vm2 }
 0x154   : > { %v381_v18 = vmul.f32 %v745_v16, %v380_v17 }
 0x156   : > { %v382_v19 = vmul.f32 0.5, %v381_v18 }
 0x158   : > { %v383_v20 = vsub.f32 1.5, %v382_v19 }
 0x15a   : > { %v384_v21 = vmul.f32 %v745_v16, %v383_v20 }
 0x15c   : > { %v388_v22 = vsel %vm387_vm4, %v745_v16, %v384_v21 }
 0x15d   : > { %v389_v23 = vmul.f32 %v388_v22, %v371_v8 }
 0x15f   : > { %390 = vst.msk [vmem:[%s325_s18] sm:$0xff] %vm374_vm1, %v389_v23 }
 0x160   : > { %865 = shalt.err (!%p862_p7)
}
 0x161   : > { %675 = dma.vmem_to_hbm [thread:$0]  (%p1053_p5), %s450_s14, 128, %s452_s15, %s427_s17  }
 0x162   : > { %s461_s29 = scalar_lea.hbm %s1260_s5, %s1177_s19  ;;  %s332_s11 = scalar_lea.vmem [#allocation9], %s1150_s23 }
 0x163   : > { %s463_s13 = sshll.u32 %s332_s11, 4  ;;  %s465_s14 = sshll.u32 %s461_s29, 4  ;;  %s464_s13 = int_to_ptr.vmem [resolvable:$true] %s463_s13  ;;  %s466_s14 = int_to_ptr.hbm [resolvable:$true] %s465_s14 }
 0x164   : > { %s475_s16 = scalar_lea.hbm %s1261_s6, %s1177_s19  ;;  %s1209_s0 = scalar_lea.sflag [#allocation10], %s276_s1 }
 0x165   : > { %s886_s28 = scalar_lea.hbm %s1260_s5, 16 }
 0x1bb   : > { %v397_v24 = vpop.xlane.xlu0 %396 }
 0x1bc   : > { %v398_v25 = vmax.f32 %v397_v24, 1e-24 }
 0x1be   : > { %746 = vrsqrt.f32 %v398_v25  ;;  %vm405_vm6 = vweird.f32 %v398_v25 }
 0x1c4   : > { %v747_v26 = vpop.eup %746 }
 0x1c5   : > { %v400_v27 = vmul.f32 %v747_v26, %v398_v25  ;;  %vm406_vm5 = vweird.f32 %v747_v26 }
 0x1c6   : > { %vm407_vm7 = vmor %vm405_vm6, %vm406_vm5 }
 0x1c7   : > { %v401_v28 = vmul.f32 %v747_v26, %v400_v27 }
 0x1c9   : > { %v402_v29 = vmul.f32 0.5, %v401_v28 }
 0x1cb   : > { %v403_v30 = vsub.f32 1.5, %v402_v29 }
 0x1cd   : > { %v404_v31 = vmul.f32 %v747_v26, %v403_v30 }
 0x1cf   : > { %v408_v32 = vsel %vm407_vm7, %v747_v26, %v404_v31 }
 0x1d0   : > { %v409_v33 = vmul.f32 %v408_v32, %v371_v8 }
 0x1d2   : > { %411 = vrot.lane.b32.xlu2 %v409_v33, %s978_s10  ;;  %v420_v34 = vadd.f32 %v418_v11, %v409_v33 }
 0x1da   : > { %422 = vrot.lane.b32.xlu2 %v420_v34, %s978_s10  ;;  %s880_s10 = sshra.s32 %s466_s14, 4  ;;  %s881_s10 = int_to_ptr.hbm [resolvable:$true] %s880_s10 }
 0x1db   : > { %s882_s30 = scalar_lea.hbm %s881_s10, 8  ;;  %p887_p11 = scmp.lt.s32.totalorder %s881_s10, %s1260_s5 }
 0x1dc   : > { %p883_p10 = scmp.ne.s32.totalorder %s881_s10, %s882_s30  ;;  %p888_p12 = scmp.lt.s32.totalorder %s886_s28, %s882_s30 }
 0x1de   : > { %p884_p2 = pnand %p883_p10, %p1053_p5  ;;  %p889_p1 = por %p888_p12, %p887_p11 }
 0x1e0   : > { %p885_p3 = pneg %p884_p2 }
 0x1e2   : > { %p890_p0 = pnand %p889_p1, %p885_p3 }
 0x22c   : > { %v412_v35 = vpop.permute.xlu2 %411 }
 0x22d   : > { %414 = vst.msk [vmem:[%s332_s11] sm:$0xff] %vm374_vm1, %v412_v35 }
 0x22e   : > { %893 = shalt.err (!%p890_p0)
}
 0x22f   : > { %676 = dma.vmem_to_hbm [thread:$0]  (%p1053_p5), %s464_s13, 128, %s466_s14, %s1209_s0  }
 0x230   : > { %s339_s25 = scalar_lea.vmem [#allocation11], %s1150_s23  ;;  %s479_s19 = sshll.u32 %s475_s16, 4  ;;  %s480_s19 = int_to_ptr.hbm [resolvable:$true] %s479_s19 }
 0x231   : > { %s477_s1 = sshll.u32 %s339_s25, 4  ;;  %s908_s18 = sshra.s32 %s480_s19, 4  ;;  %s478_s1 = int_to_ptr.vmem [resolvable:$true] %s477_s1  ;;  %s909_s18 = int_to_ptr.hbm [resolvable:$true] %s908_s18 }
 0x232   : > { %s910_s29 = scalar_lea.hbm %s909_s18, 8  ;;  %s914_s17 = scalar_lea.hbm %s1261_s6, 16 }
 0x233   : > { %p911_p8 = scmp.ne.s32.totalorder %s909_s18, %s910_s29  ;;  %p915_p6 = scmp.lt.s32.totalorder %s909_s18, %s1261_s6 }
 0x234   : > { %v423_v36 = vpop.permute.xlu2 %422  ;;  %p916_p7 = scmp.lt.s32.totalorder %s914_s17, %s910_s29 }
 0x235   : > { %425 = vst.msk [vmem:[%s339_s25] sm:$0xff] %vm374_vm1, %v423_v36  ;;  %p912_p4 = pnand %p911_p8, %p1053_p5 }
 0x236   : > { %p917_p10 = por %p916_p7, %p915_p6 }
 0x237   : > { %p913_p13 = pneg %p912_p4 }
 0x239   : > { %p918_p2 = pnand %p917_p10, %p913_p13 }
 0x23b   : > { %921 = shalt.err (!%p918_p2)
}
 0x23c   : > { %677 = dma.vmem_to_hbm [thread:$0]  (%p1053_p5), %s478_s1, 128, %s480_s19, %s1209_s0  }
 0x23d PF: > { %s491_s14 = sand.u32 1, %s960_s21   ;;  %p1279_p3 = scmp.ge.s32.totalorder %s972_s24, 2 }
 0x23e   : > { %s492_s16 = scalar_lea.sflag [#allocation4], %s491_s14 }
 0x23f   : > { %p693_p11 = pnand %p1279_p3, %p1067_p9 }
 0x241   : > { %p694_p12 = pneg %p693_p11 }
 0x243   : > { %951 = dma.done.wait (%p694_p12), %s492_s16, 128  }
 0x244   : > { %953 = vsyncadd (%p694_p12), %s492_s16, 4294967168  ;;  %s1280_s10 = sadd.s32 4294967294, %s972_s24  }
 0x245   : > { %s501_s30 = sand.u32 1, %s1280_s10  }
 0x246   : > { %s502_s26 = scalar_lea.sflag [#allocation10], %s501_s30 }
 0x247   : > { %955 = dma.done.wait (%p694_p12), %s502_s26, 256  }
 0x248   : > { %957 = vsyncadd (%p694_p12), %s502_s26, 4294967040  ;;  %s1281_s7 = sld [smem:[#allocation17_spill]]  ;;  %p24_p5 = scmp.ge.s32.totalorder %s1039_s27, 4  }
 0x249   : > { %s1282_s23 = sld [smem:[#allocation18_spill]]  ;;  %s1283_s21 = smov %s964_s22 }
 0x24a   : > { %s1285_s24 = smov %s1039_s27  ;;  %26 = sbr.rel (!%p24_p5) target bundleno = 11 (0xb), region = 128 }
 0x24e   : > { %s1284_s22 = smov %s1281_s7 }
 0x24f   :  { %518 = vsyncpa [#allocation3], 1 }
 0x250   :  { %520 = vsyncpa [#allocation3 + $0x1], 1 }
 0x251   :  { %521 = vsyncpa [#allocation6], 1 }
 0x252   :  { %522 = vsyncpa [#allocation4], 1 }
 0x253   :  { %524 = vsyncpa [#allocation4 + $0x1], 1 }
 0x254   :  { %525 = vsyncpa [#allocation10], 1 }
 0x255   :  { %527 = vsyncpa [#allocation10 + $0x1], 1 }

</bundles_post_ra>
